<compile_context>
chip_gen: v5e
topology: v5e:2x2
jax: 0.10.0
libtpu: 0.0.40
codegen_flags: <defaults>
</compile_context>

<pallas_src>
import functools

import jax
import jax.numpy as jnp
from jax.experimental import pallas as pl
from jax.experimental.pallas import tpu as pltpu

_LANE = 128
_SUBLANE = 8


def _round_up(x: int, m: int) -> int:
    return ((x + m - 1) // m) * m


def _adaptable_net_kernel(x_ref, w1_ref, b1_ref, w2_ref, b2_ref, o_ref, *, out_dim):
    # ---- Linear(input_dim -> hidden) + ReLU --------------------------------
    h = jnp.dot(x_ref[...], w1_ref[...], preferred_element_type=jnp.float32)
    h = jnp.maximum(h + b1_ref[...], 0.0)          # (TN, Hp) + (1, Hp) broadcast

    # ---- Linear(hidden -> output_dim) --------------------------------------
    logits = jnp.dot(h, w2_ref[...], preferred_element_type=jnp.float32)
    logits = logits + b2_ref[...]                  # (TN, Op) + (1, Op) broadcast

    # ---- mask padded lanes, then numerically-stable log_softmax ------------
    lane = jax.lax.broadcasted_iota(jnp.int32, logits.shape, dimension=1)
    logits = jnp.where(lane < out_dim, logits, jnp.float32(-1e30))

    m = jnp.max(logits, axis=-1, keepdims=True)
    shifted = logits - m
    lse = jnp.log(jnp.sum(jnp.exp(shifted), axis=-1, keepdims=True))
    o_ref[...] = (shifted - lse).astype(o_ref.dtype)


def adaptable_net_forward(x, w1, b1, w2, b2, *, block_rows=256):
    """Fused MLP forward (lane-dense, batch-tiled).

    x : (N, input_dim)  float32
    w1: (input_dim, hidden)   (pre-transposed from PyTorch's (hidden, input_dim))
    b1: (1, hidden)
    w2: (hidden, output_dim)
    b2: (1, output_dim)
    returns: (N, output_dim) log-probabilities
    """
    n, in_dim = x.shape
    hidden = w1.shape[1]
    out_dim = w2.shape[1]

    # Pad feature axes to full 128-lane multiples (zero padding is inert for
    # the matmuls; padded logits are masked in-kernel).
    in_p = _round_up(max(in_dim, 1), _LANE)
    hid_p = _round_up(max(hidden, 1), _LANE)
    out_p = _round_up(max(out_dim, 1), _LANE)

    # Batch tile: multiple of 8 sublanes, capped so double-buffered activation
    # tiles stay tiny relative to v7x's 64 MiB VMEM.
    tn = min(block_rows, _round_up(n, _SUBLANE))
    n_p = _round_up(n, tn)

    x_p = jnp.zeros((n_p, in_p), jnp.float32).at[:n, :in_dim].set(x)
    w1_p = jnp.zeros((in_p, hid_p), jnp.float32).at[:in_dim, :hidden].set(w1)
    b1_p = jnp.zeros((1, hid_p), jnp.float32).at[:, :hidden].set(b1)
    w2_p = jnp.zeros((hid_p, out_p), jnp.float32).at[:hidden, :out_dim].set(w2)
    b2_p = jnp.zeros((1, out_p), jnp.float32).at[:, :out_dim].set(b2)

    grid = (n_p // tn,)
    kernel = functools.partial(_adaptable_net_kernel, out_dim=out_dim)

    out_padded = pl.pallas_call(
        kernel,
        out_shape=jax.ShapeDtypeStruct((n_p, out_p), jnp.float32),
        grid=grid,
        in_specs=[
            pl.BlockSpec((tn, in_p), lambda i: (i, 0)),      # activations: tiled
            pl.BlockSpec((in_p, hid_p), lambda i: (0, 0)),   # weights: resident
            pl.BlockSpec((1, hid_p), lambda i: (0, 0)),
            pl.BlockSpec((hid_p, out_p), lambda i: (0, 0)),
            pl.BlockSpec((1, out_p), lambda i: (0, 0)),
        ],
        out_specs=pl.BlockSpec((tn, out_p), lambda i: (i, 0)),
        compiler_params=pltpu.CompilerParams(
            dimension_semantics=("parallel",),
        ),
    )(x_p, w1_p, b1_p, w2_p, b2_p)

    return out_padded[:n, :out_dim]


def init_params(key, input_dim, output_dim, hidden):
    """Deterministic init mimicking nn.Linear's uniform(-1/sqrt(fan_in), ...)."""
    k1, k2, k3, k4 = jax.random.split(key, 4)
    bound1 = 1.0 / jnp.sqrt(input_dim)
    bound2 = 1.0 / jnp.sqrt(hidden)
    # Stored directly in the (in, out) layout used by the kernel.
    w1 = jax.random.uniform(k1, (input_dim, hidden), jnp.float32, -bound1, bound1)
    b1 = jax.random.uniform(k2, (1, hidden), jnp.float32, -bound1, bound1)
    w2 = jax.random.uniform(k3, (hidden, output_dim), jnp.float32, -bound2, bound2)
    b2 = jax.random.uniform(k4, (1, output_dim), jnp.float32, -bound2, bound2)
    return w1, b1, w2, b2


def reference_forward(x, w1, b1, w2, b2):
    """Pure-JAX reference matching the PyTorch forward semantics."""
    h = jnp.maximum(x @ w1 + b1, 0.0)
    logits = h @ w2 + b2
    return jax.nn.log_softmax(logits, axis=1)


if __name__ == "__main__":
    # Small shapes consistent with the module: batch N=8, input_dim=16,
    # hidden_size=[32], output_dim=10.
    N, INPUT_DIM, HIDDEN, OUTPUT_DIM = 8, 16, 32, 10

    key = jax.random.PRNGKey(0)
    k_x, k_p = jax.random.split(key)
    x = jax.random.normal(k_x, (N, INPUT_DIM), jnp.float32)
    w1, b1, w2, b2 = init_params(k_p, INPUT_DIM, OUTPUT_DIM, HIDDEN)

    out = adaptable_net_forward(x, w1, b1, w2, b2)
    out = jax.block_until_ready(out)

    ref = reference_forward(x, w1, b1, w2, b2)
    assert out.shape == (N, OUTPUT_DIM)
    assert jnp.allclose(out, ref, atol=1e-5, rtol=1e-5), "mismatch vs reference"

    print("KERNEL_OK")
</pallas_src>

<mosaic_0001>
module attributes {stable_mosaic.version = 11 : i64} {
  func.func @_adaptable_net_kernel(%arg0: i32, %arg1: memref<8x128xf32, #tpu.memory_space<vmem>>, %arg2: memref<128x128xf32, #tpu.memory_space<vmem>>, %arg3: memref<1x128xf32, #tpu.memory_space<vmem>>, %arg4: memref<128x128xf32, #tpu.memory_space<vmem>>, %arg5: memref<1x128xf32, #tpu.memory_space<vmem>>, %arg6: memref<8x128xf32, #tpu.memory_space<vmem>>) attributes {dimension_semantics = [#tpu.dimension_semantics<parallel>], iteration_bounds = array<i64: 1>, scalar_prefetch = 0 : i64, scratch_operands = 0 : i64, tpu.core_type = #tpu.core_type<tc>, window_params = [{transform_indices = @transform_0, window_bounds = array<i64: 8, 128>}, {pipeline_mode = #tpu.pipeline_mode<synchronous>, transform_indices = @transform_1, window_bounds = array<i64: 128, 128>}, {pipeline_mode = #tpu.pipeline_mode<synchronous>, transform_indices = @transform_2, window_bounds = array<i64: 1, 128>}, {pipeline_mode = #tpu.pipeline_mode<synchronous>, transform_indices = @transform_3, window_bounds = array<i64: 128, 128>}, {pipeline_mode = #tpu.pipeline_mode<synchronous>, transform_indices = @transform_4, window_bounds = array<i64: 1, 128>}, {transform_indices = @transform_5, window_bounds = array<i64: 8, 128>}]} {
    %c0 = arith.constant 0 : index
    %c0_0 = arith.constant 0 : index
    %0 = vector.load %arg1[%c0, %c0_0] : memref<8x128xf32, #tpu.memory_space<vmem>>, vector<8x128xf32>
    %c0_1 = arith.constant 0 : index
    %c0_2 = arith.constant 0 : index
    %1 = vector.load %arg2[%c0_1, %c0_2] : memref<128x128xf32, #tpu.memory_space<vmem>>, vector<128x128xf32>
    %cst = arith.constant dense<0.000000e+00> : vector<8x128xf32>
    %2 = tpu.matmul %0, %1, %cst {dimension_numbers = #tpu.dot_dimension_numbers<[1], [0], [0], [1], [0, 0, 1, 1], [], []>} : vector<8x128xf32>, vector<128x128xf32>, vector<8x128xf32> -> vector<8x128xf32>
    %c0_3 = arith.constant 0 : index
    %c0_4 = arith.constant 0 : index
    %3 = vector.load %arg3[%c0_3, %c0_4] : memref<1x128xf32, #tpu.memory_space<vmem>>, vector<1x128xf32>
    %4 = vector.broadcast %3 : vector<1x128xf32> to vector<8x128xf32>
    %5 = arith.addf %2, %4 : vector<8x128xf32>
    %cst_5 = arith.constant 0.000000e+00 : f32
    %6 = vector.broadcast %cst_5 : f32 to vector<8x128xf32>
    %7 = arith.maximumf %5, %6 : vector<8x128xf32>
    %c0_6 = arith.constant 0 : index
    %c0_7 = arith.constant 0 : index
    %8 = vector.load %arg4[%c0_6, %c0_7] : memref<128x128xf32, #tpu.memory_space<vmem>>, vector<128x128xf32>
    %cst_8 = arith.constant dense<0.000000e+00> : vector<8x128xf32>
    %9 = tpu.matmul %7, %8, %cst_8 {dimension_numbers = #tpu.dot_dimension_numbers<[1], [0], [0], [1], [0, 0, 1, 1], [], []>} : vector<8x128xf32>, vector<128x128xf32>, vector<8x128xf32> -> vector<8x128xf32>
    %c0_9 = arith.constant 0 : index
    %c0_10 = arith.constant 0 : index
    %10 = vector.load %arg5[%c0_9, %c0_10] : memref<1x128xf32, #tpu.memory_space<vmem>>, vector<1x128xf32>
    %11 = vector.broadcast %10 : vector<1x128xf32> to vector<8x128xf32>
    %12 = arith.addf %9, %11 : vector<8x128xf32>
    %13 = tpu.iota {dimensions = array<i32: 1>} : vector<8x128xi32>
    %c10_i32 = arith.constant 10 : i32
    %14 = vector.broadcast %c10_i32 : i32 to vector<8x128xi32>
    %15 = arith.cmpi slt, %13, %14 : vector<8x128xi32>
    %cst_11 = arith.constant -1.000000e+30 : f32
    %16 = vector.broadcast %cst_11 : f32 to vector<8x128xf32>
    %17 = arith.select %15, %12, %16 : vector<8x128xi1>, vector<8x128xf32>
    %cst_12 = arith.constant dense<0xFF800000> : vector<8xf32>
    %18 = vector.multi_reduction <maximumf>, %17, %cst_12 [1] : vector<8x128xf32> to vector<8xf32>
    %19 = vector.shape_cast %18 : vector<8xf32> to vector<8x1xf32>
    %20 = vector.broadcast %19 : vector<8x1xf32> to vector<8x128xf32>
    %21 = arith.subf %17, %20 : vector<8x128xf32>
    %22 = math.exp %21 : vector<8x128xf32>
    %cst_13 = arith.constant dense<0.000000e+00> : vector<8xf32>
    %23 = vector.multi_reduction <add>, %22, %cst_13 [1] : vector<8x128xf32> to vector<8xf32>
    %24 = vector.shape_cast %23 : vector<8xf32> to vector<8x1xf32>
    %25 = math.log %24 : vector<8x1xf32>
    %26 = vector.broadcast %25 : vector<8x1xf32> to vector<8x128xf32>
    %27 = arith.subf %21, %26 : vector<8x128xf32>
    %c0_14 = arith.constant 0 : index
    %c0_15 = arith.constant 0 : index
    %28 = vector.load %arg6[%c0_14, %c0_15] : memref<8x128xf32, #tpu.memory_space<vmem>>, vector<8x128xf32>
    tpu.vector_store %arg6[%c0_14, %c0_15], %27 {strides = array<i32>} : memref<8x128xf32, #tpu.memory_space<vmem>>, vector<8x128xf32>,
    return
  }
  func.func @transform_0(%arg0: i32) -> (i32, i32) {
    %c0_i32 = arith.constant 0 : i32
    %c0_i32_0 = arith.constant 0 : i32
    return %arg0, %c0_i32 : i32, i32
  }
  func.func @transform_1(%arg0: i32) -> (i32, i32) {
    %c0_i32 = arith.constant 0 : i32
    %c0_i32_0 = arith.constant 0 : i32
    %c0_i32_1 = arith.constant 0 : i32
    return %c0_i32, %c0_i32_0 : i32, i32
  }
  func.func @transform_2(%arg0: i32) -> (i32, i32) {
    %c0_i32 = arith.constant 0 : i32
    %c0_i32_0 = arith.constant 0 : i32
    %c0_i32_1 = arith.constant 0 : i32
    return %c0_i32, %c0_i32_0 : i32, i32
  }
  func.func @transform_3(%arg0: i32) -> (i32, i32) {
    %c0_i32 = arith.constant 0 : i32
    %c0_i32_0 = arith.constant 0 : i32
    %c0_i32_1 = arith.constant 0 : i32
    return %c0_i32, %c0_i32_0 : i32, i32
  }
  func.func @transform_4(%arg0: i32) -> (i32, i32) {
    %c0_i32 = arith.constant 0 : i32
    %c0_i32_0 = arith.constant 0 : i32
    %c0_i32_1 = arith.constant 0 : i32
    return %c0_i32, %c0_i32_0 : i32, i32
  }
  func.func @transform_5(%arg0: i32) -> (i32, i32) {
    %c0_i32 = arith.constant 0 : i32
    %c0_i32_0 = arith.constant 0 : i32
    return %arg0, %c0_i32 : i32, i32
  }
}

</mosaic_0001>

<bundles_post_ra>
// kernel: tpu_custom_call.1
= control target key start
LH: loop header
LB: loop body
LE: loop exit
PB: predicated region body
PF: predicated region fallthrough
CT: control target
= control target key end

     0   :  { %10 = vsyncpa [#allocation3], 0  ;;  %s349_s0 = inlined_call_operand.hbm [shape: f32[8,128], index: 0, kind: input, shape index: {}]   ;;  %s350_s1 = inlined_call_operand.hbm [shape: f32[128,128], index: 1, kind: input, shape index: {}]   ;;  %s351_s2 = inlined_call_operand.vmem [shape: f32[1,128], index: 2, kind: input, shape index: {}]   ;;  %s352_s3 = inlined_call_operand.hbm [shape: f32[128,128], index: 3, kind: input, shape index: {}]   ;;  %s353_s4 = inlined_call_operand.vmem [shape: f32[1,128], index: 4, kind: input, shape index: {}]   ;;  %s354_s5 = inlined_call_operand.hbm [shape: f32[8,128], index: 5, kind: output, shape index: {}]  }
   0x1   :  { %11 = vsyncpa [#allocation6], 0  ;;  %s28_s20 = sshll.u32 %s350_s1, 4  ;;  %s29_s20 = int_to_ptr.hbm [resolvable:$true] %s28_s20 }
   0x2   :  { %12 = vsyncpa [#allocation4], 0  ;;  %s295_s21 = smov [#allocation5]   ;;  %s18_s25 = sshll.u32 %s349_s0, 4  ;;  %s19_s25 = int_to_ptr.hbm [resolvable:$true] %s18_s25 }
   0x3   :  { %s30_s22 = sshll.u32 %s295_s21, 4  ;;  %s296_s26 = smov 128   ;;  %s31_s22 = int_to_ptr.vmem [resolvable:$true] %s30_s22 }
   0x4   :  { %s297_s27 = smov 8   ;;  %s298_s28 = smov [#allocation2]  }
   0x5   :  { %36 = dma.hbm_to_vmem [thread:$0]  %s29_s20, 2048, %s31_s22, [#allocation6], %s296_s26, %s296_s26, %s297_s27  }
   0x6   :  { %s20_s29 = sshll.u32 %s298_s28, 4  ;;  %s43_s7 = sshll.u32 %s352_s3, 4  ;;  %s21_s29 = int_to_ptr.vmem [resolvable:$true] %s20_s29  ;;  %s44_s7 = int_to_ptr.hbm [resolvable:$true] %s43_s7 }
   0x7   :  { %23 = dma.hbm_to_vmem [thread:$0]  %s19_s25, 128, %s21_s29, [#allocation3]  }
   0x8   :  { %s299_s1 = smov [#allocation7]  }
   0x9   :  { %s45_s8 = sshll.u32 %s299_s1, 4  ;;  %s46_s8 = int_to_ptr.vmem [resolvable:$true] %s45_s8 }
   0xa   :  { %51 = dma.hbm_to_vmem [thread:$0]  %s44_s7, 2048, %s46_s8, [#allocation6], %s296_s26, %s296_s26, %s297_s27  }
   0xb   :  { %289 = dma.done.wait [#allocation3], 128  }
   0xc   :  { %290 = vsyncadd [#allocation3], 4294967168 }
   0xd   :  { %291 = dma.done.wait [#allocation6], 4096  }
   0xe   :  { %292 = vsyncadd [#allocation6], 4294963200  ;;  %v82_v0 = vld [vmem:[#allocation5 + $0x78] sm:$0xff]  ;;  %v81_v1 = vld [vmem:[#allocation5 + $0x70] sm:$0xff]  ;;  %v148_v37 = vlaneseq }
   0xf   :  { %87 = vmatpush.msra.mxu0 %v82_v0  ;;  %v80_v2 = vld [vmem:[#allocation5 + $0x68] sm:$0xff]  ;;  %v79_v3 = vld [vmem:[#allocation5 + $0x60] sm:$0xff]  ;;  %v123_v4 = vld [vmem:[#allocation7 + $0x78] sm:$0xff] }
  0x10   :  { %v78_v5 = vld [vmem:[#allocation5 + $0x58] sm:$0xff]  ;;  %128 = vmatpush.msra.mxu1 %v123_v4  ;;  %v122_v6 = vld [vmem:[#allocation7 + $0x70] sm:$0xff]  ;;  %v121_v7 = vld [vmem:[#allocation7 + $0x68] sm:$0xff]  ;;  %v149_v38 = vand.u32 127, %v148_v37 }
  0x11   :  { %88 = vmatpush.msra.mxu0 %v81_v1  ;;  %v77_v8 = vld [vmem:[#allocation5 + $0x50] sm:$0xff]  ;;  %v120_v9 = vld [vmem:[#allocation7 + $0x60] sm:$0xff]  ;;  %v76_v10 = vld [vmem:[#allocation5 + $0x48] sm:$0xff] }
  0x12   :  { %129 = vmatpush.msra.mxu1 %v122_v6  ;;  %v119_v11 = vld [vmem:[#allocation7 + $0x58] sm:$0xff]  ;;  %v75_v12 = vld [vmem:[#allocation5 + $0x40] sm:$0xff]  ;;  %v118_v13 = vld [vmem:[#allocation7 + $0x50] sm:$0xff]  ;;  %vm150_vm0 = vcmp.lt.s32.totalorder %v149_v38, 10 }
  0x13   :  { %89 = vmatpush.msra.mxu0 %v80_v2  ;;  %v74_v14 = vld [vmem:[#allocation5 + $0x38] sm:$0xff]  ;;  %v117_v15 = vld [vmem:[#allocation7 + $0x48] sm:$0xff]  ;;  %v73_v16 = vld [vmem:[#allocation5 + $0x30] sm:$0xff] }
  0x14   :  { %130 = vmatpush.msra.mxu1 %v121_v7  ;;  %v116_v17 = vld [vmem:[#allocation7 + $0x40] sm:$0xff]  ;;  %v72_v18 = vld [vmem:[#allocation5 + $0x28] sm:$0xff]  ;;  %v115_v19 = vld [vmem:[#allocation7 + $0x38] sm:$0xff] }
  0x15   :  { %90 = vmatpush.msra.mxu0 %v79_v3  ;;  %v71_v20 = vld [vmem:[#allocation5 + $0x20] sm:$0xff]  ;;  %v114_v21 = vld [vmem:[#allocation7 + $0x30] sm:$0xff]  ;;  %v70_v22 = vld [vmem:[#allocation5 + $0x18] sm:$0xff] }
  0x16   :  { %131 = vmatpush.msra.mxu1 %v120_v9  ;;  %v113_v23 = vld [vmem:[#allocation7 + $0x28] sm:$0xff]  ;;  %v69_v24 = vld [vmem:[#allocation5 + $0x10] sm:$0xff]  ;;  %v112_v25 = vld [vmem:[#allocation7 + $0x20] sm:$0xff] }
  0x17   :  { %91 = vmatpush.msra.mxu0 %v78_v5  ;;  %v68_v26 = vld [vmem:[#allocation5 + $0x8] sm:$0xff]  ;;  %v111_v27 = vld [vmem:[#allocation7 + $0x18] sm:$0xff]  ;;  %v67_v28 = vld [vmem:[#allocation5] sm:$0xff] }
  0x18   :  { %132 = vmatpush.msra.mxu1 %v119_v11  ;;  %v66_v29 = vld [vmem:[#allocation2] sm:$0xff]  ;;  %v110_v30 = vld [vmem:[#allocation7 + $0x10] sm:$0xff]  ;;  %v109_v31 = vld [vmem:[#allocation7 + $0x8] sm:$0xff] }
  0x19   :  { %92 = vmatpush.msra.mxu0 %v77_v8  ;;  %v108_v32 = vld [vmem:[#allocation7] sm:$0xff]  ;;  %v187_v33 = vld [vmem:[%s351_s2] ss:$0 sm:$0xff]  ;;  %s300_s2 = smov [#allocation8]  }
  0x1a   :  { %133 = vmatpush.msra.mxu1 %v118_v13  ;;  %v188_v39 = vld [vmem:[%s353_s4] ss:$0 sm:$0xff]  ;;  %s168_s11 = sshll.u32 %s300_s2, 4  ;;  %s170_s4 = sshll.u32 %s354_s5, 4  ;;  %s169_s11 = int_to_ptr.vmem [resolvable:$true] %s168_s11  ;;  %s171_s4 = int_to_ptr.hbm [resolvable:$true] %s170_s4 }
  0x1b   :  { %93 = vmatpush.msra.mxu0 %v76_v10 }
  0x1c   :  { %134 = vmatpush.msra.mxu1 %v117_v15 }
  0x1d   :  { %94 = vmatpush.msra.mxu0 %v75_v12 }
  0x1e   :  { %135 = vmatpush.msra.mxu1 %v116_v17 }
  0x1f   :  { %95 = vmatpush.msra.mxu0 %v74_v14 }
  0x20   :  { %136 = vmatpush.msra.mxu1 %v115_v19 }
  0x21   :  { %96 = vmatpush.msra.mxu0 %v73_v16 }
  0x22   :  { %137 = vmatpush.msra.mxu1 %v114_v21 }
  0x23   :  { %97 = vmatpush.msra.mxu0 %v72_v18 }
  0x24   :  { %138 = vmatpush.msra.mxu1 %v113_v23 }
  0x25   :  { %98 = vmatpush.msra.mxu0 %v71_v20 }
  0x26   :  { %139 = vmatpush.msra.mxu1 %v112_v25 }
  0x27   :  { %99 = vmatpush.msra.mxu0 %v70_v22 }
  0x28   :  { %140 = vmatpush.msra.mxu1 %v111_v27 }
  0x29   :  { %100 = vmatpush.msra.mxu0 %v69_v24 }
  0x2a   :  { %141 = vmatpush.msra.mxu1 %v110_v30 }
  0x2b   :  { %101 = vmatpush.msra.mxu0 %v68_v26 }
  0x2c   :  { %142 = vmatpush.msra.mxu1 %v109_v31 }
  0x2d   :  { %102 = vmatpush.msra.mxu0 %v67_v28 }
  0x2e   :  { %103 = vmatmul.f32.vlgmr.msra.gmra.mxu0 %v66_v29  ;;  %143 = vmatpush.msra.mxu1 %v108_v32 }
  0xab   :  { %v104_v34 = vpop.f32.mrf.mxu0 }
  0xac   :  { %v105_v35 = vadd.f32 %v187_v33, %v104_v34 }
  0xae   :  { %v107_v36 = vmax.f32 %v105_v35, 0.0 }
  0xb0   :  { %144 = vmatmul.f32.vlgmr.msra.gmra.mxu1 %v107_v36 }
 0x12d   :  { %v145_v40 = vpop.f32.mrf.mxu1 }
 0x12e   :  { %v146_v41 = vadd.f32 %v188_v39, %v145_v40 }
 0x130   :  { %v151_v42 = vsel %vm150_vm0, %v146_v41, -1e+30 }
 0x131   :  { %152 = vmax.xlane.f32.xlu0 %v151_v42 }
 0x1a4   :  { %v153_v43 = vpop.xlane.xlu0 %152 }
 0x1a5   :  { %v154_v44 = vsub.f32 %v151_v42, %v153_v43 }
 0x1a7   :  { %v155_v45 = vmul.f32 1.442695, %v154_v44 }
 0x1a9   :  { %189 = vpow2.f32 %v155_v45 }
 0x1af   :  { %v190_v46 = vpop.eup %189 }
 0x1b0   :  { %157 = vadd.xlane.f32.xlu0 %v190_v46 }
 0x223   :  { %v158_v47 = vpop.xlane.xlu0 %157 }
 0x224   :  { %191 = vlog2.f32 %v158_v47 }
 0x22a   :  { %v192_v48 = vpop.eup %191 }
 0x22b   :  { %v160_v49 = vmul.f32 0.6931472, %v192_v48 }
 0x22d   :  { %v161_v50 = vsub.f32 %v154_v44, %v160_v49 }
 0x22f   :  { %162 = vst [vmem:[#allocation8] sm:$0xff] %v161_v50 }
 0x230   :  { %173 = dma.vmem_to_hbm [thread:$0]  %s169_s11, 128, %s171_s4, [#allocation4]  }
 0x231   :  { %293 = dma.done.wait [#allocation4], 128  }
 0x232   :  { %294 = vsyncadd [#allocation4], 4294967168 }
 0x233   :  { %178 = vsyncpa [#allocation3], 1 }
 0x234   :  { %179 = vsyncpa [#allocation6], 1 }
 0x235   :  { %180 = vsyncpa [#allocation4], 1 }

</bundles_post_ra>
